<compile_context>
chip_gen: v5e
topology: v5e:2x2
jax: 0.10.0
libtpu: 0.0.40
codegen_flags: <defaults>
</compile_context>

<pallas_src>
import jax
import jax.numpy as jnp
from jax.experimental import pallas as pl
from jax.experimental.pallas import tpu as pltpu

_SUBLANES = 8
_LANE_WIDTHS = (1024, 512, 256, 128)


def _round_up(x: int, m: int) -> int:
    return ((x + m - 1) // m) * m


def _is_multi_core_chip() -> bool:
    """True for chips with >1 TensorCore per chip (v7x) — gates CORE_PARALLEL."""
    try:
        kind = jax.devices()[0].device_kind.lower()
    except Exception:
        return False
    return "v7" in kind


def _make_partial_sumsq_kernel(total_rows: int, tile_rows: int):
    def kernel(pred_ref, target_ref, out_ref):
        i = pl.program_id(0)
        last = pl.num_programs(0) - 1

        # Hot path: elementwise diff/square in f32 (free for f32 inputs, the
        # numerically-safe upcast for bf16 inputs).
        d = pred_ref[...].astype(jnp.float32) - target_ref[...].astype(jnp.float32)
        sq = d * d

        # Full blocks: plain per-block reduce, no masking cost.
        @pl.when(i != last)
        def _():
            out_ref[0, 0] = jnp.sum(sq)

        # Last (possibly ragged) block: zero out rows past the end of the real
        # array (Pallas leaves the out-of-range part of a partial block
        # unspecified), then reduce.
        @pl.when(i == last)
        def _():
            rem = total_rows - i * tile_rows  # rows still valid in this block
            row_ids = jax.lax.broadcasted_iota(jnp.int32, sq.shape, 0)
            out_ref[0, 0] = jnp.sum(jnp.where(row_ids < rem, sq, 0.0))

    return kernel


def log_mse_loss(
    y_pred: jax.Array,
    y_true: jax.Array,
    *,
    target_block_bytes: int = 8 * 1024 * 1024,
) -> jax.Array:
    """log(MSE(y_pred, y_true)) with the sum of squares computed in a Pallas TPU kernel."""
    assert y_pred.shape == y_true.shape, (y_pred.shape, y_true.shape)
    n_elems = int(y_pred.size)
    inv_n = jnp.float32(1.0 / n_elems)  # multiply instead of divide in the epilogue

    # ---- Lane-dense canonicalization (free reshapes, no HBM copy) ----------
    flat_pred = jnp.reshape(y_pred, (-1,))
    flat_true = jnp.reshape(y_true, (-1,))

    lanes = None
    for c in _LANE_WIDTHS:
        if n_elems % c == 0:
            lanes = c
            break
    if lanes is None:
        # TODO(synk): element counts not divisible by 128 fall back to a small
        # zero-pad (one extra HBM copy of each input); could be replaced by
        # in-kernel element-level masking of the flattened tail.
        lanes = 128
        padded_n = _round_up(n_elems, lanes)
        flat_pred = jnp.pad(flat_pred, (0, padded_n - n_elems))
        flat_true = jnp.pad(flat_true, (0, padded_n - n_elems))

    rows = flat_pred.shape[0] // lanes
    pred2 = flat_pred.reshape(rows, lanes)
    true2 = flat_true.reshape(rows, lanes)

    # ---- Block sizing -------------------------------------------------------
    itemsize = jnp.dtype(y_pred.dtype).itemsize
    budget_rows = max(
        _SUBLANES,
        (target_block_bytes // max(1, lanes * itemsize)) // _SUBLANES * _SUBLANES,
    )
    if rows <= budget_rows:
        tile_rows = rows        # single block; full-dim block is always legal
    else:
        tile_rows = budget_rows  # multiple of 8; ragged last block masked in-kernel
    num_blocks = pl.cdiv(rows, tile_rows)

    # Derive the VMEM limit from actual usage: 2 inputs x double-buffer x block
    # (+ margin), instead of a hardcoded 48 MiB.
    block_bytes = tile_rows * lanes * itemsize
    vmem_limit = min(128 * 1024 * 1024,
                     max(16 * 1024 * 1024, 4 * block_bytes + 4 * 1024 * 1024))

    # All grid blocks are independent -> PARALLEL; upgrade to CORE_PARALLEL on
    # dual-TensorCore chips (v7x) so both cores stream half the blocks.
    if _is_multi_core_chip() and num_blocks >= 2:
        dim_sems = (pltpu.CORE_PARALLEL,)
    else:
        dim_sems = (pltpu.PARALLEL,)

    partials = pl.pallas_call(
        _make_partial_sumsq_kernel(rows, tile_rows),
        out_shape=jax.ShapeDtypeStruct((num_blocks, 1), jnp.float32),
        grid_spec=pltpu.PrefetchScalarGridSpec(
            num_scalar_prefetch=0,
            grid=(num_blocks,),
            in_specs=[
                pl.BlockSpec((tile_rows, lanes), lambda i: (i, 0)),
                pl.BlockSpec((tile_rows, lanes), lambda i: (i, 0)),
            ],
            out_specs=pl.BlockSpec(
                (1, 1), lambda i: (i, 0), memory_space=pltpu.SMEM
            ),
        ),
        compiler_params=pltpu.CompilerParams(
            dimension_semantics=dim_sems,
            vmem_limit_bytes=vmem_limit,
        ),
    )(pred2, true2)

    # Tiny scalar epilogue in plain JAX: combine per-block partials, scale, log.
    return jnp.log(jnp.sum(partials) * inv_n)


if __name__ == "__main__":
    key = jax.random.PRNGKey(0)
    k1, k2, k3, k4, k5, k6 = jax.random.split(key, 6)

    # Small (batch, features) regression-style inputs.
    y_pred = jax.random.normal(k1, (16, 128), dtype=jnp.float32)
    y_true = jax.random.normal(k2, (16, 128), dtype=jnp.float32)
    loss = jax.block_until_ready(log_mse_loss(y_pred, y_true))
    ref = jnp.log(jnp.mean((y_pred - y_true) ** 2))
    assert jnp.allclose(loss, ref, rtol=1e-5, atol=1e-6), (loss, ref)

    # Multi-block path with a ragged (in-kernel masked) last block: tiny blocks.
    yp2 = jax.random.normal(k3, (200, 128), dtype=jnp.float32)
    yt2 = jax.random.normal(k4, (200, 128), dtype=jnp.float32)
    loss2 = jax.block_until_ready(
        log_mse_loss(yp2, yt2, target_block_bytes=8 * 1024 * 4)
    )
    ref2 = jnp.log(jnp.mean((yp2 - yt2) ** 2))
    assert jnp.allclose(loss2, ref2, rtol=1e-5, atol=1e-6), (loss2, ref2)

    # Narrow / non-128-divisible feature dim exercising the lane-dense
    # canonicalization fallback path.
    yp3 = jax.random.normal(k5, (7, 33), dtype=jnp.float32)
    yt3 = jax.random.normal(k6, (7, 33), dtype=jnp.float32)
    loss3 = jax.block_until_ready(log_mse_loss(yp3, yt3))
    ref3 = jnp.log(jnp.mean((yp3 - yt3) ** 2))
    assert jnp.allclose(loss3, ref3, rtol=1e-5, atol=1e-6), (loss3, ref3)

    print("KERNEL_OK")
</pallas_src>

<mosaic_0001>
module attributes {stable_mosaic.version = 11 : i64} {
  func.func @kernel(%arg0: i32, %arg1: memref<2x1024xf32, #tpu.memory_space<vmem>>, %arg2: memref<2x1024xf32, #tpu.memory_space<vmem>>, %arg3: memref<1x1xf32, #tpu.memory_space<smem>>) attributes {dimension_semantics = [#tpu.dimension_semantics<parallel>], iteration_bounds = array<i64: 1>, scalar_prefetch = 0 : i64, scratch_operands = 0 : i64, tpu.core_type = #tpu.core_type<tc>, window_params = [{transform_indices = @transform_0, window_bounds = array<i64: 2, 1024>}, {transform_indices = @transform_1, window_bounds = array<i64: 2, 1024>}, {transform_indices = @transform_2, window_bounds = array<i64: 1, 1>}]} {
    %c0 = arith.constant 0 : index
    %c0_0 = arith.constant 0 : index
    %0 = vector.load %arg1[%c0, %c0_0] : memref<2x1024xf32, #tpu.memory_space<vmem>>, vector<2x1024xf32>
    %c0_1 = arith.constant 0 : index
    %c0_2 = arith.constant 0 : index
    %1 = vector.load %arg2[%c0_1, %c0_2] : memref<2x1024xf32, #tpu.memory_space<vmem>>, vector<2x1024xf32>
    %2 = arith.subf %0, %1 : vector<2x1024xf32>
    %3 = arith.mulf %2, %2 : vector<2x1024xf32>
    %c0_i32 = arith.constant 0 : i32
    %4 = arith.cmpi ne, %arg0, %c0_i32 : i32
    %5 = arith.extui %4 : i1 to i32
    %c0_i32_3 = arith.constant 0 : i32
    %6 = arith.cmpi ne, %5, %c0_i32_3 : i32
    scf.if %6 {
      %10 = vector.shape_cast %3 : vector<2x1024xf32> to vector<1x2x1024xf32>
      %cst = arith.constant dense<0.000000e+00> : vector<1xf32>
      %11 = vector.multi_reduction <add>, %10, %cst [1, 2] : vector<1x2x1024xf32> to vector<1xf32>
      %12 = vector.shape_cast %11 : vector<1xf32> to vector<1x1x1xf32>
      %13 = vector.extract %12[0, 0, 0] : f32 from vector<1x1x1xf32>
      %c0_6 = arith.constant 0 : index
      %c0_7 = arith.constant 0 : index
      %14 = memref.load %arg3[%c0_6, %c0_7] : memref<1x1xf32, #tpu.memory_space<smem>>
      memref.store %13, %arg3[%c0_6, %c0_7] : memref<1x1xf32, #tpu.memory_space<smem>>
    } else {
    }
    %c0_i32_4 = arith.constant 0 : i32
    %7 = arith.cmpi eq, %arg0, %c0_i32_4 : i32
    %8 = arith.extui %7 : i1 to i32
    %c0_i32_5 = arith.constant 0 : i32
    %9 = arith.cmpi ne, %8, %c0_i32_5 : i32
    scf.if %9 {
      %c2_i32 = arith.constant 2 : i32
      %10 = arith.muli %arg0, %c2_i32 : i32
      %c2_i32_6 = arith.constant 2 : i32
      %11 = arith.subi %c2_i32_6, %10 : i32
      %12 = tpu.iota {dimensions = array<i32: 0>} : vector<2x1024xi32>
      %13 = vector.broadcast %11 : i32 to vector<2x1024xi32>
      %14 = arith.cmpi slt, %12, %13 : vector<2x1024xi32>
      %cst = arith.constant 0.000000e+00 : f32
      %15 = vector.broadcast %cst : f32 to vector<2x1024xf32>
      %16 = arith.select %14, %3, %15 : vector<2x1024xi1>, vector<2x1024xf32>
      %17 = vector.shape_cast %16 : vector<2x1024xf32> to vector<1x2x1024xf32>
      %cst_7 = arith.constant dense<0.000000e+00> : vector<1xf32>
      %18 = vector.multi_reduction <add>, %17, %cst_7 [1, 2] : vector<1x2x1024xf32> to vector<1xf32>
      %19 = vector.shape_cast %18 : vector<1xf32> to vector<1x1x1xf32>
      %20 = vector.extract %19[0, 0, 0] : f32 from vector<1x1x1xf32>
      %c0_8 = arith.constant 0 : index
      %c0_9 = arith.constant 0 : index
      %21 = memref.load %arg3[%c0_8, %c0_9] : memref<1x1xf32, #tpu.memory_space<smem>>
      memref.store %20, %arg3[%c0_8, %c0_9] : memref<1x1xf32, #tpu.memory_space<smem>>
    } else {
    }
    return
  }
  func.func @transform_0(%arg0: i32) -> (i32, i32) {
    %c0_i32 = arith.constant 0 : i32
    %c0_i32_0 = arith.constant 0 : i32
    return %arg0, %c0_i32 : i32, i32
  }
  func.func @transform_1(%arg0: i32) -> (i32, i32) {
    %c0_i32 = arith.constant 0 : i32
    %c0_i32_0 = arith.constant 0 : i32
    return %arg0, %c0_i32 : i32, i32
  }
  func.func @transform_2(%arg0: i32) -> (i32, i32) {
    %c0_i32 = arith.constant 0 : i32
    %c0_i32_0 = arith.constant 0 : i32
    return %arg0, %c0_i32 : i32, i32
  }
}

</mosaic_0001>

<bundles_post_ra>
// kernel: tpu_custom_call.1
= control target key start
LH: loop header
LB: loop body
LE: loop exit
PB: predicated region body
PF: predicated region fallthrough
CT: control target
= control target key end

     0   :  { %7 = vsyncpa [#allocation3], 0  ;;  %s297_s0 = inlined_call_operand.hbm [shape: f32[2,1024], index: 0, kind: input, shape index: {}]   ;;  %s298_s1 = inlined_call_operand.hbm [shape: f32[2,1024], index: 1, kind: input, shape index: {}]   ;;  %s299_s2 = inlined_call_operand.hbm [shape: f32[1,1], index: 2, kind: output, shape index: {}]  }
   0x1   :  { %8 = vsyncpa [#allocation6], 0 }
   0x2   :  { %9 = vsyncpa [#allocation4], 0  ;;  %s15_s11 = sshll.u32 %s297_s0, 4  ;;  %s254_s12 = smov [#allocation2]   ;;  %s16_s11 = int_to_ptr.hbm [resolvable:$true] %s15_s11 }
   0x3   :  { %s17_s13 = sshll.u32 %s254_s12, 4  ;;  %s26_s16 = sshll.u32 %s298_s1, 4  ;;  %s18_s13 = int_to_ptr.vmem [resolvable:$true] %s17_s13  ;;  %s27_s16 = int_to_ptr.hbm [resolvable:$true] %s26_s16 }
   0x4   :  { %20 = dma.hbm_to_vmem [thread:$0]  %s16_s11, 256, %s18_s13, [#allocation3]  }
   0x5   :  { %s255_s17 = smov [#allocation5]  }
   0x6   :  { %s28_s18 = sshll.u32 %s255_s17, 4  ;;  %s29_s18 = int_to_ptr.vmem [resolvable:$true] %s28_s18 }
   0x7   :  { %31 = dma.hbm_to_vmem [thread:$0]  %s27_s16, 256, %s29_s18, [#allocation6]  }
   0x8   :  { %248 = dma.done.wait [#allocation3], 256  }
   0x9   :  { %249 = vsyncadd [#allocation3], 4294967040 }
   0xa   :  { %250 = dma.done.wait [#allocation6], 256  }
   0xb   :  { %251 = vsyncadd [#allocation6], 4294967040  ;;  %v40_v0 = vld [vmem:[#allocation2] sm:$0xff]  ;;  %v41_v1 = vld [vmem:[#allocation2 + $0x8] sm:$0xff]  ;;  %v106_v8 = vlaneseq  ;;  %vm139_vm1 = vcmask 1041408   ;;  %s171_s19 = sshll.u32 %s299_s2, 4  ;;  %s172_s19 = int_to_ptr.hbm [resolvable:$true] %s171_s19 }
   0xc   :  { %v42_v2 = vld [vmem:[#allocation5] sm:$0xff]  ;;  %v43_v3 = vld [vmem:[#allocation5 + $0x8] sm:$0xff]  ;;  %s256_s21 = smov [#allocation7]  }
   0xd   :  { %v44_v4 = vsub.f32 %v40_v0, %v42_v2  ;;  %v45_v5 = vsub.f32 %v41_v1, %v43_v3  ;;  %v107_v9 = vshrl.u32 %v106_v8, 7 }
   0xf   :  { %v46_v6 = vmul.f32 %v44_v4, %v44_v4  ;;  %v47_v7 = vmul.f32 %v45_v5, %v45_v5  ;;  %vm109_vm0 = vcmp.lt.s32.totalorder %v107_v9, 2 }
  0x11   :  { %112 = vst [vmem:[#allocation1] ss:$4 sm:$0xff] %v46_v6 }
  0x12   :  { %114 = vst [vmem:[#allocation1 + $0x20] ss:$4 sm:$0xff] %v47_v7 }
  0x18   :  { %v115_v10 = vld.sshfl [vmem:[#allocation1] sm:$0xff pattern:$0x73625140]  ;;  %v116_v11 = vld.sshfl [vmem:[#allocation1 + $0x8] sm:$0xff pattern:$0x73625140] }
  0x19   :  { %v117_v12 = vld.sshfl [vmem:[#allocation1 + $0x10] sm:$0xff pattern:$0x73625140]  ;;  %v118_v13 = vld.sshfl [vmem:[#allocation1 + $0x18] sm:$0xff pattern:$0x73625140] }
  0x1a   :  { %v119_v14 = vld.sshfl [vmem:[#allocation1 + $0x20] sm:$0xff pattern:$0x73625140]  ;;  %v131_v15 = vsel %vm109_vm0, %v115_v10, 0.0  ;;  %v132_v16 = vsel %vm109_vm0, %v116_v11, 0.0  ;;  %v133_v17 = vsel %vm109_vm0, %v117_v12, 0.0 }
  0x1b   :  { %v134_v18 = vsel %vm109_vm0, %v118_v13, 0.0  ;;  %v120_v19 = vld.sshfl [vmem:[#allocation1 + $0x28] sm:$0xff pattern:$0x73625140]  ;;  %v140_v20 = vsel %vm139_vm1, %v131_v15, 0.0  ;;  %v141_v21 = vsel %vm139_vm1, %v132_v16, 0.0 }
  0x1c   :  { %v143_v22 = vsel %vm139_vm1, %v133_v17, 0.0  ;;  %v135_v23 = vsel %vm109_vm0, %v119_v14, 0.0  ;;  %v142_v24 = vadd.f32 %v141_v21, %v140_v20  ;;  %v121_v25 = vld.sshfl [vmem:[#allocation1 + $0x30] sm:$0xff pattern:$0x73625140]  ;;  %v145_v26 = vsel %vm139_vm1, %v134_v18, 0.0 }
  0x1d   :  { %v136_v27 = vsel %vm109_vm0, %v120_v19, 0.0  ;;  %v122_v29 = vld.sshfl [vmem:[#allocation1 + $0x38] sm:$0xff pattern:$0x73625140]  ;;  %v147_v30 = vsel %vm139_vm1, %v135_v23, 0.0  ;;  %v137_v31 = vsel %vm109_vm0, %v121_v25, 0.0 }
  0x1e   :  { %v144_v28 = vadd.f32 %v143_v22, %v142_v24  ;;  %v149_v33 = vsel %vm139_vm1, %v136_v27, 0.0  ;;  %v138_v34 = vsel %vm109_vm0, %v122_v29, 0.0  ;;  %v151_v36 = vsel %vm139_vm1, %v137_v31, 0.0 }
  0x1f   :  { %v153_v38 = vsel %vm139_vm1, %v138_v34, 0.0 }
  0x20   :  { %v146_v32 = vadd.f32 %v145_v26, %v144_v28 }
  0x22   :  { %v148_v35 = vadd.f32 %v147_v30, %v146_v32 }
  0x24   :  { %v150_v37 = vadd.f32 %v149_v33, %v148_v35 }
  0x26   :  { %v152_v39 = vadd.f32 %v151_v36, %v150_v37 }
  0x28   :  { %v154_v40 = vadd.f32 %v153_v38, %v152_v39 }
  0x2a   :  { %155 = vadd.xlane.f32.xlu0 %v154_v40 }
  0x9d   :  { %v156_v41 = vpop.xlane.xlu0 %155 }
  0x9e   :  { %v157_v42 = vrot.slane %v156_v41, 4 }
  0xa0   :  { %v158_v43 = vadd.f32 %v157_v42, %v156_v41 }
  0xa2   :  { %v159_v44 = vrot.slane %v158_v43, 2 }
  0xa4   :  { %v160_v45 = vadd.f32 %v159_v44, %v158_v43 }
  0xa6   :  { %v161_v46 = vrot.slane %v160_v45, 1 }
  0xa8   :  { %v162_v47 = vadd.f32 %v161_v46, %v160_v45 }
  0xaa   :  { %183 = vpush %v162_v47 }
  0xdb   :  { %s184_s20 = spop %183 }
  0xdc   :  { %165 = sst [smem:[#allocation7]] %s184_s20 }
  0xdd   :  { %174 = dma.smem_to_hbm %s256_s21, 16, %s172_s19, [#allocation4]  }
  0xde   :  { %252 = dma.done.wait [#allocation4], 16  }
  0xdf   :  { %253 = vsyncadd [#allocation4], 4294967280 }
  0xe0   :  { %179 = sfence }
  0xe1   :  { %180 = vsyncpa [#allocation3], 1 }
  0xe2   :  { %181 = vsyncpa [#allocation6], 1 }
  0xe3   :  { %182 = vsyncpa [#allocation4], 1 }

</bundles_post_ra>
